<compile_context>
chip_gen: v7x
topology: tpu7x:2x2x1
jax: 0.10.0
libtpu: 0.0.40
codegen_flags: <defaults>
</compile_context>

<pallas_src>
import functools

import jax
import jax.numpy as jnp
from jax.experimental import pallas as pl
from jax.experimental.pallas import tpu as pltpu


def _decoder_seq_kernel(chars_ref,                       # SMEM [T, B] int32 (scalar prefetch)
                        pc_ref, ctx_ref,                 # VMEM [1, Bp, C+1] each (ones col appended)
                        h0_ref, c0_ref,                  # VMEM [Bp, H]
                        w_char_ref,                      # VMEM [Vchar, 4H]  (embedding folded in)
                        w_pc_ref,                        # VMEM [C+1, 4H]    (bias folded in)
                        w_hh_ref,                        # VMEM [H, 4H]
                        w_fc_h_ref,                      # VMEM [H, V]
                        w_fc_c_ref,                      # VMEM [C+1, V]     (bias folded in)
                        out_ref,                         # VMEM [1, Bp, V+2H] = scores|h1|c1
                        h_s, c_s,                        # VMEM scratch [Bp, H] f32 (carried over T)
                        *, batch, hidden_size):
    H = hidden_size
    t = pl.program_id(0)
    Bp = h_s.shape[0]
    n_char = w_char_ref.shape[0]
    wdt = w_char_ref.dtype

    @pl.when(t == 0)
    def _init():
        h_s[...] = h0_ref[...]
        c_s[...] = c0_ref[...]

    # ---- embedding lookup as a one-hot MXU matmul (no dynamic VMEM indexing) ----------
    row_ids = jax.lax.broadcasted_iota(jnp.int32, (Bp, n_char), 0)
    col_ids = jax.lax.broadcasted_iota(jnp.int32, (Bp, n_char), 1)
    onehot = jnp.zeros((Bp, n_char), jnp.float32)
    for b in range(batch):                                # small static batch loop
        cid = chars_ref[t, b]                             # SMEM scalar read
        onehot = onehot + jnp.where((row_ids == b) & (col_ids == cid), 1.0, 0.0)

    pc = pc_ref[0]                                        # [Bp, C+1] f32 (prev_context | 1)
    ctx = ctx_ref[0]                                      # [Bp, C+1] f32 (context | 1)
    h = h_s[...]                                          # [Bp, H] f32
    c = c_s[...]                                          # [Bp, H] f32

    # ---- all four LSTM gates via three accumulated dots (biases folded into w_pc) -----
    gates = (jnp.dot(onehot.astype(wdt), w_char_ref[...], preferred_element_type=jnp.float32)
             + jnp.dot(pc.astype(wdt), w_pc_ref[...], preferred_element_type=jnp.float32)
             + jnp.dot(h.astype(wdt), w_hh_ref[...], preferred_element_type=jnp.float32))

    # One EUP sigmoid pass over all 4H=128 gate lanes; tanh(g) = 2*sigmoid(2g)-1 with the
    # x2 folded into the g-gate weight columns at pack time.  Elementwise math stays f32
    # (v5e has no bf16 VPU/EUP).  Gate slices live in different 32-lane windows of the
    # single (8,128) vreg -> a few XLU rotates; XLU slot is otherwise idle here.
    s = jax.nn.sigmoid(gates)
    i_g = s[:, 0 * H:1 * H]
    f_g = s[:, 1 * H:2 * H]
    g_g = 2.0 * s[:, 2 * H:3 * H] - 1.0
    o_g = s[:, 3 * H:4 * H]

    c1 = f_g * c + i_g * g_g
    h1 = o_g * jnp.tanh(c1)

    # Dropout is identity in eval mode (inference semantics).
    # fc(cat(h1, context)) as two accumulated dots (no in-kernel lane concat of operands).
    scores = (jnp.dot(h1.astype(wdt), w_fc_h_ref[...], preferred_element_type=jnp.float32)
              + jnp.dot(ctx.astype(wdt), w_fc_c_ref[...], preferred_element_type=jnp.float32))

    # Lane-dense packed output: scores | h1 | c1 -> one unmasked (8,128) store per step.
    out_ref[0] = jnp.concatenate([scores, h1, c1], axis=-1)

    # Carry the recurrent state to the next grid step.
    h_s[...] = h1
    c_s[...] = c1


def pack_params(params, param_dtype=jnp.float32):
    """Pack PyTorch-layout parameters into the fused kernel weight slabs.

    w_char   [Vchar, 4H] : embedding @ W_ih(:, :E)^T   (embedding folded into gate proj)
    w_pc     [C+1,  4H]  : [W_ih(:, E:)^T ; b_ih + b_hh]
    w_hh     [H,    4H]  : W_hh^T
    w_fc_h   [H,     V]  : W_fc(:, :H)^T
    w_fc_c   [C+1,   V]  : [W_fc(:, H:)^T ; b_fc]
    The g-gate columns of the three LSTM slabs are pre-scaled by 2 (tanh-via-sigmoid).
    """
    H = params["w_hh"].shape[1]
    E = params["embedding"].shape[1]

    w_ih_t = jnp.asarray(params["w_ih"], jnp.float32).T          # [E+C, 4H]
    w_hh_t = jnp.asarray(params["w_hh"], jnp.float32).T          # [H, 4H]
    bias = (params["b_ih"] + params["b_hh"]).astype(jnp.float32)[None, :]   # [1, 4H]

    gate_scale = jnp.concatenate(
        [jnp.ones((2 * H,), jnp.float32), jnp.full((H,), 2.0, jnp.float32),
         jnp.ones((H,), jnp.float32)])[None, :]

    w_char = (params["embedding"].astype(jnp.float32) @ w_ih_t[:E]) * gate_scale   # [Vc, 4H]
    w_pc = jnp.concatenate([w_ih_t[E:], bias], axis=0) * gate_scale                # [C+1, 4H]
    w_hh = w_hh_t * gate_scale                                                     # [H, 4H]

    w_fc_t = jnp.asarray(params["w_fc"], jnp.float32).T                            # [H+C, V]
    w_fc_h = w_fc_t[:H]                                                            # [H, V]
    w_fc_c = jnp.concatenate(
        [w_fc_t[H:], params["b_fc"].astype(jnp.float32)[None, :]], axis=0)         # [C+1, V]

    slabs = {"w_char": w_char, "w_pc": w_pc, "w_hh": w_hh,
             "w_fc_h": w_fc_h, "w_fc_c": w_fc_c}
    return {k: v.astype(param_dtype) for k, v in slabs.items()}


@jax.jit
def decoder_forward_sequence(packed, characters_seq, previous_context_seq, context_seq,
                             hidden_state):
    """Run T decoder steps inside ONE pallas_call (teacher-forced character ids).

    characters_seq: [T, B] int, previous_context_seq/context_seq: [T, B, C],
    hidden_state = (h0, c0) each [1, B, H].
    Returns (scores_seq [T, B, V], (h_T [1,B,H], c_T [1,B,H])).
    """
    h0, c0 = hidden_state
    h0_2d = h0[0].astype(jnp.float32)
    c0_2d = c0[0].astype(jnp.float32)

    T, B = characters_seq.shape
    H = packed["w_hh"].shape[0]
    V = packed["w_fc_h"].shape[1]
    C = context_seq.shape[-1]
    n_char = packed["w_char"].shape[0]

    # Pad the batch to a full 8-sublane tile so every vreg op / store is unmasked.
    Bp = max(8, ((B + 7) // 8) * 8)
    pad = Bp - B

    ones = jnp.ones((T, B, 1), jnp.float32)
    pc_aug = jnp.concatenate([previous_context_seq.astype(jnp.float32), ones], axis=-1)
    ctx_aug = jnp.concatenate([context_seq.astype(jnp.float32), ones], axis=-1)
    if pad:
        pc_aug = jnp.pad(pc_aug, ((0, 0), (0, pad), (0, 0)))
        ctx_aug = jnp.pad(ctx_aug, ((0, 0), (0, pad), (0, 0)))
        h0_2d = jnp.pad(h0_2d, ((0, pad), (0, 0)))
        c0_2d = jnp.pad(c0_2d, ((0, pad), (0, 0)))
    chars = characters_seq.astype(jnp.int32)

    w_bytes = sum(int(packed[k].size) * packed[k].dtype.itemsize
                  for k in ("w_char", "w_pc", "w_hh", "w_fc_h", "w_fc_c"))
    flops = T * (2 * Bp * (n_char + (C + 1) + H) * 4 * H + 2 * Bp * (H + C + 1) * V)
    transcendentals = T * Bp * 5 * H
    bytes_accessed = 4 * (pc_aug.size + ctx_aug.size + h0_2d.size + c0_2d.size
                          + T * Bp * (V + 2 * H)) + w_bytes

    def seq_spec(last):                       # per-timestep blocks
        return pl.BlockSpec((1, Bp, last), lambda i, _ids: (i, 0, 0))

    def const_spec(shape):                    # VMEM-resident across the whole grid
        nd = len(shape)
        return pl.BlockSpec(shape, lambda i, _ids, _nd=nd: (0,) * _nd)

    grid_spec = pltpu.PrefetchScalarGridSpec(
        num_scalar_prefetch=1,
        grid=(T,),
        in_specs=[
            seq_spec(C + 1),                   # previous_context | 1
            seq_spec(C + 1),                   # context | 1
            const_spec((Bp, H)),               # h0
            const_spec((Bp, H)),               # c0
            const_spec((n_char, 4 * H)),       # w_char
            const_spec((C + 1, 4 * H)),        # w_pc
            const_spec((H, 4 * H)),            # w_hh
            const_spec((H, V)),                # w_fc_h
            const_spec((C + 1, V)),            # w_fc_c
        ],
        out_specs=pl.BlockSpec((1, Bp, V + 2 * H), lambda i, _ids: (i, 0, 0)),
        scratch_shapes=[pltpu.VMEM((Bp, H), jnp.float32),
                        pltpu.VMEM((Bp, H), jnp.float32)],
    )

    out = pl.pallas_call(
        functools.partial(_decoder_seq_kernel, batch=B, hidden_size=H),
        grid_spec=grid_spec,
        out_shape=jax.ShapeDtypeStruct((T, Bp, V + 2 * H), jnp.float32),
        compiler_params=pltpu.CompilerParams(
            # Timestep axis carries h/c -> must stay sequential ("arbitrary").
            dimension_semantics=("arbitrary",)),
        cost_estimate=pl.CostEstimate(flops=int(flops),
                                      transcendentals=int(transcendentals),
                                      bytes_accessed=int(bytes_accessed)),
    )(chars, pc_aug, ctx_aug, h0_2d, c0_2d,
      packed["w_char"], packed["w_pc"], packed["w_hh"],
      packed["w_fc_h"], packed["w_fc_c"])

    scores_seq = out[:, :B, :V]
    h_last = out[-1, :B, V:V + H]
    c_last = out[-1, :B, V + H:V + 2 * H]
    return scores_seq, (h_last[None, :, :], c_last[None, :, :])


def decoder_forward(packed, characters, previous_context, context, hidden_state):
    """Mirrors Decoder.forward (eval mode): one step. Returns (scores [B,V], (h1, c1))."""
    scores_seq, new_hidden = decoder_forward_sequence(
        packed, characters[None, :], previous_context[None], context[None], hidden_state)
    return scores_seq[0], new_hidden


def init_params(key, nbr_characters, embed_dim, context_dim, hidden_size):
    """Deterministic synthetic parameters in PyTorch layout."""
    ks = jax.random.split(key, 7)
    rnn_in = embed_dim + context_dim
    scale = 0.1
    return {
        "embedding": scale * jax.random.normal(ks[0], (nbr_characters, embed_dim), jnp.float32),
        "w_ih": scale * jax.random.normal(ks[1], (4 * hidden_size, rnn_in), jnp.float32),
        "w_hh": scale * jax.random.normal(ks[2], (4 * hidden_size, hidden_size), jnp.float32),
        "b_ih": scale * jax.random.normal(ks[3], (4 * hidden_size,), jnp.float32),
        "b_hh": scale * jax.random.normal(ks[4], (4 * hidden_size,), jnp.float32),
        "w_fc": scale * jax.random.normal(ks[5], (nbr_characters, hidden_size + context_dim), jnp.float32),
        "b_fc": scale * jax.random.normal(ks[6], (nbr_characters,), jnp.float32),
    }


def _reference_forward(params, characters, previous_context, context, hidden_state):
    """Pure-JAX mirror of the PyTorch forward (eval mode), from unpacked params."""
    h0, c0 = hidden_state
    emb = jnp.take(params["embedding"], characters, axis=0)
    x = jnp.concatenate([emb, previous_context], axis=-1)
    gates = (x @ params["w_ih"].T + h0[0] @ params["w_hh"].T
             + params["b_ih"] + params["b_hh"])
    H = h0.shape[-1]
    i = jax.nn.sigmoid(gates[:, :H])
    f = jax.nn.sigmoid(gates[:, H:2 * H])
    g = jnp.tanh(gates[:, 2 * H:3 * H])
    o = jax.nn.sigmoid(gates[:, 3 * H:])
    c1 = f * c0[0] + i * g
    h1 = o * jnp.tanh(c1)
    fc_in = jnp.concatenate([h1, context], axis=-1)
    scores = fc_in @ params["w_fc"].T + params["b_fc"]
    return scores, (h1[None], c1[None])


if __name__ == "__main__":
    B = 2
    nbr_characters = 64
    embed_dim = 16
    context_dim = 32
    hidden_size = 32
    T = 6

    key = jax.random.PRNGKey(0)
    (k_par, k_chr, k_pc, k_ctx, k_h, k_c,
     k_chr_seq, k_pc_seq, k_ctx_seq) = jax.random.split(key, 9)

    params = init_params(k_par, nbr_characters, embed_dim, context_dim, hidden_size)
    packed_f32 = pack_params(params, jnp.float32)

    characters = jax.random.randint(k_chr, (B,), 0, nbr_characters, dtype=jnp.int32)
    previous_context = jax.random.normal(k_pc, (B, context_dim), jnp.float32)
    context = jax.random.normal(k_ctx, (B, context_dim), jnp.float32)
    h0 = jax.random.normal(k_h, (1, B, hidden_size), jnp.float32)
    c0 = jax.random.normal(k_c, (1, B, hidden_size), jnp.float32)

    # ---- single step (exactly Decoder.forward) ------------------------------------
    scores, (h1, c1) = decoder_forward(packed_f32, characters, previous_context, context,
                                       (h0, c0))
    jax.block_until_ready((scores, h1, c1))

    ref_scores, (ref_h1, ref_c1) = _reference_forward(
        params, characters, previous_context, context, (h0, c0))

    assert scores.shape == (B, nbr_characters)
    assert h1.shape == (1, B, hidden_size) and c1.shape == (1, B, hidden_size)
    assert jnp.allclose(scores, ref_scores, atol=1e-4, rtol=1e-4)
    assert jnp.allclose(h1, ref_h1, atol=1e-4, rtol=1e-4)
    assert jnp.allclose(c1, ref_c1, atol=1e-4, rtol=1e-4)

    # ---- T decode steps inside ONE pallas_call (internalized timestep loop) -------
    characters_seq = jax.random.randint(k_chr_seq, (T, B), 0, nbr_characters, dtype=jnp.int32)
    pc_seq = jax.random.normal(k_pc_seq, (T, B, context_dim), jnp.float32)
    ctx_seq = jax.random.normal(k_ctx_seq, (T, B, context_dim), jnp.float32)

    scores_seq, (hT, cT) = decoder_forward_sequence(packed_f32, characters_seq, pc_seq,
                                                    ctx_seq, (h0, c0))
    jax.block_until_ready((scores_seq, hT, cT))

    ref_state = (h0, c0)
    ref_scores_list = []
    for t in range(T):
        s_t, ref_state = _reference_forward(params, characters_seq[t], pc_seq[t],
                                            ctx_seq[t], ref_state)
        ref_scores_list.append(s_t)
    ref_scores_seq = jnp.stack(ref_scores_list, axis=0)

    assert scores_seq.shape == (T, B, nbr_characters)
    assert jnp.allclose(scores_seq, ref_scores_seq, atol=1e-4, rtol=1e-4)
    assert jnp.allclose(hT, ref_state[0], atol=1e-4, rtol=1e-4)
    assert jnp.allclose(cT, ref_state[1], atol=1e-4, rtol=1e-4)

    # ---- bf16 weight slabs (MXU-friendly on v6e/v7x), f32 elementwise path --------
    packed_bf16 = pack_params(params, jnp.bfloat16)
    scores_bf, (h1_bf, c1_bf) = decoder_forward(packed_bf16, characters, previous_context,
                                                context, (h0, c0))
    jax.block_until_ready((scores_bf, h1_bf, c1_bf))
    assert jnp.allclose(scores_bf, ref_scores, atol=5e-2, rtol=5e-2)
    assert jnp.allclose(h1_bf, ref_h1, atol=5e-2, rtol=5e-2)
    assert jnp.allclose(c1_bf, ref_c1, atol=5e-2, rtol=5e-2)

    print("KERNEL_OK")
</pallas_src>

<mosaic_0001>
module attributes {stable_mosaic.version = 11 : i64} {
  func.func @_decoder_seq_kernel(%arg0: i32, %arg1: memref<1x2xi32, #tpu.memory_space<smem>>, %arg2: memref<1x8x33xf32, #tpu.memory_space<vmem>>, %arg3: memref<1x8x33xf32, #tpu.memory_space<vmem>>, %arg4: memref<8x32xf32, #tpu.memory_space<vmem>>, %arg5: memref<8x32xf32, #tpu.memory_space<vmem>>, %arg6: memref<64x128xf32, #tpu.memory_space<vmem>>, %arg7: memref<33x128xf32, #tpu.memory_space<vmem>>, %arg8: memref<32x128xf32, #tpu.memory_space<vmem>>, %arg9: memref<32x64xf32, #tpu.memory_space<vmem>>, %arg10: memref<33x64xf32, #tpu.memory_space<vmem>>, %arg11: memref<1x8x128xf32, #tpu.memory_space<vmem>>, %arg12: memref<8x32xf32, #tpu.memory_space<vmem>>, %arg13: memref<8x32xf32, #tpu.memory_space<vmem>>) attributes {dimension_semantics = [#tpu.dimension_semantics<arbitrary>], iteration_bounds = array<i64: 1>, scalar_prefetch = 1 : i64, scratch_operands = 2 : i64, tpu.core_type = #tpu.core_type<tc>, window_params = [{transform_indices = @transform_0, window_bounds = array<i64: 1, 8, 33>}, {transform_indices = @transform_1, window_bounds = array<i64: 1, 8, 33>}, {pipeline_mode = #tpu.pipeline_mode<synchronous>, transform_indices = @transform_2, window_bounds = array<i64: 8, 32>}, {pipeline_mode = #tpu.pipeline_mode<synchronous>, transform_indices = @transform_3, window_bounds = array<i64: 8, 32>}, {pipeline_mode = #tpu.pipeline_mode<synchronous>, transform_indices = @transform_4, window_bounds = array<i64: 64, 128>}, {pipeline_mode = #tpu.pipeline_mode<synchronous>, transform_indices = @transform_5, window_bounds = array<i64: 33, 128>}, {pipeline_mode = #tpu.pipeline_mode<synchronous>, transform_indices = @transform_6, window_bounds = array<i64: 32, 128>}, {pipeline_mode = #tpu.pipeline_mode<synchronous>, transform_indices = @transform_7, window_bounds = array<i64: 32, 64>}, {pipeline_mode = #tpu.pipeline_mode<synchronous>, transform_indices = @transform_8, window_bounds = array<i64: 33, 64>}, {transform_indices = @transform_9, window_bounds = array<i64: 1, 8, 128>}]} {
    %c0_i32 = arith.constant 0 : i32
    %0 = arith.cmpi eq, %arg0, %c0_i32 : i32
    %1 = arith.extui %0 : i1 to i32
    %c0_i32_0 = arith.constant 0 : i32
    %2 = arith.cmpi ne, %1, %c0_i32_0 : i32
    scf.if %2 {
      %c0_41 = arith.constant 0 : index
      %c0_42 = arith.constant 0 : index
      %71 = vector.load %arg4[%c0_41, %c0_42] : memref<8x32xf32, #tpu.memory_space<vmem>>, vector<8x32xf32>
      %c0_43 = arith.constant 0 : index
      %c0_44 = arith.constant 0 : index
      %72 = vector.load %arg12[%c0_43, %c0_44] : memref<8x32xf32, #tpu.memory_space<vmem>>, vector<8x32xf32>
      tpu.vector_store %arg12[%c0_43, %c0_44], %71 {strides = array<i32>} : memref<8x32xf32, #tpu.memory_space<vmem>>, vector<8x32xf32>,
      %c0_45 = arith.constant 0 : index
      %c0_46 = arith.constant 0 : index
      %73 = vector.load %arg5[%c0_45, %c0_46] : memref<8x32xf32, #tpu.memory_space<vmem>>, vector<8x32xf32>
      %c0_47 = arith.constant 0 : index
      %c0_48 = arith.constant 0 : index
      %74 = vector.load %arg13[%c0_47, %c0_48] : memref<8x32xf32, #tpu.memory_space<vmem>>, vector<8x32xf32>
      tpu.vector_store %arg13[%c0_47, %c0_48], %73 {strides = array<i32>} : memref<8x32xf32, #tpu.memory_space<vmem>>, vector<8x32xf32>,
    } else {
    }
    %3 = tpu.iota {dimensions = array<i32: 0>} : vector<8x64xi32>
    %4 = tpu.iota {dimensions = array<i32: 1>} : vector<8x64xi32>
    %cst = arith.constant 0.000000e+00 : f32
    %5 = vector.broadcast %cst : f32 to vector<8x64xf32>
    %6 = arith.index_cast %arg0 : i32 to index
    %c0 = arith.constant 0 : index
    %7 = memref.load %arg1[%6, %c0] : memref<1x2xi32, #tpu.memory_space<smem>>
    %c0_i32_1 = arith.constant 0 : i32
    %8 = vector.broadcast %c0_i32_1 : i32 to vector<8x64xi32>
    %9 = arith.cmpi eq, %3, %8 : vector<8x64xi32>
    %10 = vector.broadcast %7 : i32 to vector<8x64xi32>
    %11 = arith.cmpi eq, %4, %10 : vector<8x64xi32>
    %12 = arith.andi %9, %11 : vector<8x64xi1>
    %cst_2 = arith.constant 1.000000e+00 : f32
    %cst_3 = arith.constant 0.000000e+00 : f32
    %13 = vector.broadcast %cst_2 : f32 to vector<8x64xf32>
    %14 = vector.broadcast %cst_3 : f32 to vector<8x64xf32>
    %15 = arith.select %12, %13, %14 : vector<8x64xi1>, vector<8x64xf32>
    %16 = arith.addf %5, %15 : vector<8x64xf32>
    %17 = arith.index_cast %arg0 : i32 to index
    %c1 = arith.constant 1 : index
    %18 = memref.load %arg1[%17, %c1] : memref<1x2xi32, #tpu.memory_space<smem>>
    %c1_i32 = arith.constant 1 : i32
    %19 = vector.broadcast %c1_i32 : i32 to vector<8x64xi32>
    %20 = arith.cmpi eq, %3, %19 : vector<8x64xi32>
    %21 = vector.broadcast %18 : i32 to vector<8x64xi32>
    %22 = arith.cmpi eq, %4, %21 : vector<8x64xi32>
    %23 = arith.andi %20, %22 : vector<8x64xi1>
    %cst_4 = arith.constant 1.000000e+00 : f32
    %cst_5 = arith.constant 0.000000e+00 : f32
    %24 = vector.broadcast %cst_4 : f32 to vector<8x64xf32>
    %25 = vector.broadcast %cst_5 : f32 to vector<8x64xf32>
    %26 = arith.select %23, %24, %25 : vector<8x64xi1>, vector<8x64xf32>
    %27 = arith.addf %16, %26 : vector<8x64xf32>
    %c0_6 = arith.constant 0 : index
    %c0_7 = arith.constant 0 : index
    %c0_8 = arith.constant 0 : index
    %28 = vector.load %arg2[%c0_6, %c0_7, %c0_8] : memref<1x8x33xf32, #tpu.memory_space<vmem>>, vector<1x8x33xf32>
    %29 = vector.shape_cast %28 : vector<1x8x33xf32> to vector<8x33xf32>
    %c0_9 = arith.constant 0 : index
    %c0_10 = arith.constant 0 : index
    %c0_11 = arith.constant 0 : index
    %30 = vector.load %arg3[%c0_9, %c0_10, %c0_11] : memref<1x8x33xf32, #tpu.memory_space<vmem>>, vector<1x8x33xf32>
    %31 = vector.shape_cast %30 : vector<1x8x33xf32> to vector<8x33xf32>
    %c0_12 = arith.constant 0 : index
    %c0_13 = arith.constant 0 : index
    %32 = vector.load %arg12[%c0_12, %c0_13] : memref<8x32xf32, #tpu.memory_space<vmem>>, vector<8x32xf32>
    %c0_14 = arith.constant 0 : index
    %c0_15 = arith.constant 0 : index
    %33 = vector.load %arg13[%c0_14, %c0_15] : memref<8x32xf32, #tpu.memory_space<vmem>>, vector<8x32xf32>
    %c0_16 = arith.constant 0 : index
    %c0_17 = arith.constant 0 : index
    %34 = vector.load %arg6[%c0_16, %c0_17] : memref<64x128xf32, #tpu.memory_space<vmem>>, vector<64x128xf32>
    %cst_18 = arith.constant dense<0.000000e+00> : vector<8x128xf32>
    %35 = tpu.matmul %27, %34, %cst_18 {dimension_numbers = #tpu.dot_dimension_numbers<[1], [0], [0], [1], [0, 0, 1, 1], [], []>} : vector<8x64xf32>, vector<64x128xf32>, vector<8x128xf32> -> vector<8x128xf32>
    %c0_19 = arith.constant 0 : index
    %c0_20 = arith.constant 0 : index
    %36 = vector.load %arg7[%c0_19, %c0_20] : memref<33x128xf32, #tpu.memory_space<vmem>>, vector<33x128xf32>
    %cst_21 = arith.constant dense<0.000000e+00> : vector<8x128xf32>
    %37 = tpu.matmul %29, %36, %cst_21 {dimension_numbers = #tpu.dot_dimension_numbers<[1], [0], [0], [1], [0, 0, 1, 1], [], []>} : vector<8x33xf32>, vector<33x128xf32>, vector<8x128xf32> -> vector<8x128xf32>
    %38 = arith.addf %35, %37 : vector<8x128xf32>
    %c0_22 = arith.constant 0 : index
    %c0_23 = arith.constant 0 : index
    %39 = vector.load %arg8[%c0_22, %c0_23] : memref<32x128xf32, #tpu.memory_space<vmem>>, vector<32x128xf32>
    %cst_24 = arith.constant dense<0.000000e+00> : vector<8x128xf32>
    %40 = tpu.matmul %32, %39, %cst_24 {dimension_numbers = #tpu.dot_dimension_numbers<[1], [0], [0], [1], [0, 0, 1, 1], [], []>} : vector<8x32xf32>, vector<32x128xf32>, vector<8x128xf32> -> vector<8x128xf32>
    %41 = arith.addf %38, %40 : vector<8x128xf32>
    %42 = arith.negf %41 : vector<8x128xf32>
    %43 = math.exp %42 : vector<8x128xf32>
    %cst_25 = arith.constant 1.000000e+00 : f32
    %44 = vector.broadcast %cst_25 : f32 to vector<8x128xf32>
    %45 = arith.addf %44, %43 : vector<8x128xf32>
    %46 = arith.divf %44, %45 : vector<8x128xf32>
    %47 = vector.extract_strided_slice %46 {offsets = [0, 0], sizes = [8, 32], strides = [1, 1]} : vector<8x128xf32> to vector<8x32xf32>
    %48 = vector.extract_strided_slice %46 {offsets = [0, 32], sizes = [8, 32], strides = [1, 1]} : vector<8x128xf32> to vector<8x32xf32>
    %49 = vector.extract_strided_slice %46 {offsets = [0, 64], sizes = [8, 32], strides = [1, 1]} : vector<8x128xf32> to vector<8x32xf32>
    %cst_26 = arith.constant 2.000000e+00 : f32
    %50 = vector.broadcast %cst_26 : f32 to vector<8x32xf32>
    %51 = arith.mulf %50, %49 : vector<8x32xf32>
    %cst_27 = arith.constant 1.000000e+00 : f32
    %52 = vector.broadcast %cst_27 : f32 to vector<8x32xf32>
    %53 = arith.subf %51, %52 : vector<8x32xf32>
    %54 = vector.extract_strided_slice %46 {offsets = [0, 96], sizes = [8, 32], strides = [1, 1]} : vector<8x128xf32> to vector<8x32xf32>
    %55 = arith.mulf %48, %33 : vector<8x32xf32>
    %56 = arith.mulf %47, %53 : vector<8x32xf32>
    %57 = arith.addf %55, %56 : vector<8x32xf32>
    %58 = math.tanh %57 : vector<8x32xf32>
    %59 = arith.mulf %54, %58 : vector<8x32xf32>
    %c0_28 = arith.constant 0 : index
    %c0_29 = arith.constant 0 : index
    %60 = vector.load %arg9[%c0_28, %c0_29] : memref<32x64xf32, #tpu.memory_space<vmem>>, vector<32x64xf32>
    %cst_30 = arith.constant dense<0.000000e+00> : vector<8x64xf32>
    %61 = tpu.matmul %59, %60, %cst_30 {dimension_numbers = #tpu.dot_dimension_numbers<[1], [0], [0], [1], [0, 0, 1, 1], [], []>} : vector<8x32xf32>, vector<32x64xf32>, vector<8x64xf32> -> vector<8x64xf32>
    %c0_31 = arith.constant 0 : index
    %c0_32 = arith.constant 0 : index
    %62 = vector.load %arg10[%c0_31, %c0_32] : memref<33x64xf32, #tpu.memory_space<vmem>>, vector<33x64xf32>
    %cst_33 = arith.constant dense<0.000000e+00> : vector<8x64xf32>
    %63 = tpu.matmul %31, %62, %cst_33 {dimension_numbers = #tpu.dot_dimension_numbers<[1], [0], [0], [1], [0, 0, 1, 1], [], []>} : vector<8x33xf32>, vector<33x64xf32>, vector<8x64xf32> -> vector<8x64xf32>
    %64 = arith.addf %61, %63 : vector<8x64xf32>
    %65 = tpu.concatenate %64, %59, %57 in 1 : vector<8x64xf32>, vector<8x32xf32>, vector<8x32xf32> -> vector<8x128xf32>
    %c0_34 = arith.constant 0 : index
    %c0_35 = arith.constant 0 : index
    %c0_36 = arith.constant 0 : index
    %66 = vector.load %arg11[%c0_34, %c0_35, %c0_36] : memref<1x8x128xf32, #tpu.memory_space<vmem>>, vector<1x8x128xf32>
    %67 = vector.shape_cast %66 : vector<1x8x128xf32> to vector<8x128xf32>
    %68 = vector.shape_cast %65 : vector<8x128xf32> to vector<1x8x128xf32>
    tpu.vector_store %arg11[%c0_34, %c0_35, %c0_36], %68 {strides = array<i32>} : memref<1x8x128xf32, #tpu.memory_space<vmem>>, vector<1x8x128xf32>,
    %c0_37 = arith.constant 0 : index
    %c0_38 = arith.constant 0 : index
    %69 = vector.load %arg12[%c0_37, %c0_38] : memref<8x32xf32, #tpu.memory_space<vmem>>, vector<8x32xf32>
    tpu.vector_store %arg12[%c0_37, %c0_38], %59 {strides = array<i32>} : memref<8x32xf32, #tpu.memory_space<vmem>>, vector<8x32xf32>,
    %c0_39 = arith.constant 0 : index
    %c0_40 = arith.constant 0 : index
    %70 = vector.load %arg13[%c0_39, %c0_40] : memref<8x32xf32, #tpu.memory_space<vmem>>, vector<8x32xf32>
    tpu.vector_store %arg13[%c0_39, %c0_40], %57 {strides = array<i32>} : memref<8x32xf32, #tpu.memory_space<vmem>>, vector<8x32xf32>,
    return
  }
  func.func @transform_0(%arg0: i32, %arg1: memref<1x2xi32, #tpu.memory_space<smem>>) -> (i32, i32, i32) {
    %c0_i32 = arith.constant 0 : i32
    %c0_i32_0 = arith.constant 0 : i32
    %c0_i32_1 = arith.constant 0 : i32
    return %arg0, %c0_i32, %c0_i32_0 : i32, i32, i32
  }
  func.func @transform_1(%arg0: i32, %arg1: memref<1x2xi32, #tpu.memory_space<smem>>) -> (i32, i32, i32) {
    %c0_i32 = arith.constant 0 : i32
    %c0_i32_0 = arith.constant 0 : i32
    %c0_i32_1 = arith.constant 0 : i32
    return %arg0, %c0_i32, %c0_i32_0 : i32, i32, i32
  }
  func.func @transform_2(%arg0: i32, %arg1: memref<1x2xi32, #tpu.memory_space<smem>>) -> (i32, i32) {
    %c0_i32 = arith.constant 0 : i32
    %c0_i32_0 = arith.constant 0 : i32
    %c0_i32_1 = arith.constant 0 : i32
    return %c0_i32, %c0_i32_0 : i32, i32
  }
  func.func @transform_3(%arg0: i32, %arg1: memref<1x2xi32, #tpu.memory_space<smem>>) -> (i32, i32) {
    %c0_i32 = arith.constant 0 : i32
    %c0_i32_0 = arith.constant 0 : i32
    %c0_i32_1 = arith.constant 0 : i32
    return %c0_i32, %c0_i32_0 : i32, i32
  }
  func.func @transform_4(%arg0: i32, %arg1: memref<1x2xi32, #tpu.memory_space<smem>>) -> (i32, i32) {
    %c0_i32 = arith.constant 0 : i32
    %c0_i32_0 = arith.constant 0 : i32
    %c0_i32_1 = arith.constant 0 : i32
    return %c0_i32, %c0_i32_0 : i32, i32
  }
  func.func @transform_5(%arg0: i32, %arg1: memref<1x2xi32, #tpu.memory_space<smem>>) -> (i32, i32) {
    %c0_i32 = arith.constant 0 : i32
    %c0_i32_0 = arith.constant 0 : i32
    %c0_i32_1 = arith.constant 0 : i32
    return %c0_i32, %c0_i32_0 : i32, i32
  }
  func.func @transform_6(%arg0: i32, %arg1: memref<1x2xi32, #tpu.memory_space<smem>>) -> (i32, i32) {
    %c0_i32 = arith.constant 0 : i32
    %c0_i32_0 = arith.constant 0 : i32
    %c0_i32_1 = arith.constant 0 : i32
    return %c0_i32, %c0_i32_0 : i32, i32
  }
  func.func @transform_7(%arg0: i32, %arg1: memref<1x2xi32, #tpu.memory_space<smem>>) -> (i32, i32) {
    %c0_i32 = arith.constant 0 : i32
    %c0_i32_0 = arith.constant 0 : i32
    %c0_i32_1 = arith.constant 0 : i32
    return %c0_i32, %c0_i32_0 : i32, i32
  }
  func.func @transform_8(%arg0: i32, %arg1: memref<1x2xi32, #tpu.memory_space<smem>>) -> (i32, i32) {
    %c0_i32 = arith.constant 0 : i32
    %c0_i32_0 = arith.constant 0 : i32
    %c0_i32_1 = arith.constant 0 : i32
    return %c0_i32, %c0_i32_0 : i32, i32
  }
  func.func @transform_9(%arg0: i32, %arg1: memref<1x2xi32, #tpu.memory_space<smem>>) -> (i32, i32, i32) {
    %c0_i32 = arith.constant 0 : i32
    %c0_i32_0 = arith.constant 0 : i32
    %c0_i32_1 = arith.constant 0 : i32
    return %arg0, %c0_i32, %c0_i32_0 : i32, i32, i32
  }
}

</mosaic_0001>

<bundles_post_ra>
// kernel: decoder_forward_sequence.1
= control target key start
LH: loop header
LB: loop body
LE: loop exit
PB: predicated region body
PF: predicated region fallthrough
CT: control target
= control target key end

     0   :  { %s1039_s0 = inlined_call_operand.hbm [shape: s32[1,2], index: 0, kind: input, shape index: {}]   ;;  %s1040_s1 = inlined_call_operand.vmem [shape: f32[1,8,33], index: 1, kind: input, shape index: {}]   ;;  %s1041_s2 = inlined_call_operand.vmem [shape: f32[1,8,33], index: 2, kind: input, shape index: {}]   ;;  %s1042_s3 = inlined_call_operand.vmem [shape: f32[8,32], index: 3, kind: input, shape index: {}]   ;;  %s1043_s4 = inlined_call_operand.vmem [shape: f32[8,32], index: 4, kind: input, shape index: {}]   ;;  %s1044_s5 = inlined_call_operand.hbm [shape: f32[64,128], index: 5, kind: input, shape index: {}]   ;;  %s1045_s6 = inlined_call_operand.vmem [shape: f32[33,128], index: 6, kind: input, shape index: {}]   ;;  %s1046_s7 = inlined_call_operand.vmem [shape: f32[32,128], index: 7, kind: input, shape index: {}]   ;;  %s1047_s8 = inlined_call_operand.hbm [shape: f32[32,64], index: 8, kind: input, shape index: {}]   ;;  %s1048_s9 = inlined_call_operand.hbm [shape: f32[33,64], index: 9, kind: input, shape index: {}]   ;;  %s1049_s10 = inlined_call_operand.vmem [shape: f32[1,8,128], index: 10, kind: output, shape index: {}]  }
   0x1   :  { %s734_s15 = scalar_lea.hbm %s1039_s0, 16 }
   0x2   :  { %p735_p0 = scmp.ne.s32.totalorder %s1039_s0, %s734_s15  ;;  %p738_p1 = scmp.lt.u32.totalorder %s734_s15, %s1039_s0 }
   0x4   :  { %p740_p2 = pnand %p738_p1, %p735_p0 }
   0x6   :  { %743 = shalt.err (!%p740_p2)  }
   0x7   :  { %s816_s20 = smov [#allocation5]  }
   0x8   :  { %16 = dma.hbm_to_smem %s1039_s0, 16, %s816_s20, [#allocation4] }
   0x9   :  { %810 = dma.done.wait [#allocation4], 16 }
   0xa   :  { %811 = vsyncadd [#allocation4], 4294967280 }
   0xb   :  { %18 = sfence }
   0xc   :  { %19 = vsyncpa [#allocation7], 0 }
   0xd   :  { %20 = vsyncpa [#allocation9], 0  ;;  %s817_s23 = smov [#allocation8]   ;;  %s818_s25 = smov [#allocation6]  }
   0xe   :  { %s50_s24 = sshll.u32 %s817_s23, 4  ;;  %s34_s26 = sshll.u32 %s818_s25, 4  ;;  %s51_s24 = int_to_ptr.vmem [resolvable:$true] %s50_s24  ;;  %s895_s26 = int_to_ptr.vmem [resolvable:$true] %s34_s26 }
   0xf   :  { %s744_s29 = scalar_lea.hbm %s1047_s8, 512 }
  0x10   :  { %p745_p3 = scmp.ne.s32.totalorder %s1047_s8, %s744_s29  ;;  %p748_p4 = scmp.lt.u32.totalorder %s744_s29, %s1047_s8 }
  0x12   :  { %p750_p5 = pnand %p748_p4, %p745_p3 }
  0x14   :  { %753 = shalt.err (!%p750_p5)
}
  0x15   :  { %s754_s13 = scalar_lea.vmem %s51_s24, 512  ;;  %p759_p7 = scmp.lt.s32.totalorder %s51_s24, %s51_s24 }
  0x16   :  { %p755_p6 = scmp.ne.s32.totalorder %s51_s24, %s754_s13  ;;  %p760_p8 = scmp.lt.s32.totalorder %s754_s13, %s754_s13 }
  0x18   :  { %p761_p9 = por %p760_p8, %p759_p7 }
  0x1a   :  { %p762_p10 = pnand %p761_p9, %p755_p6 }
  0x1c   :  { %765 = shalt.err (!%p762_p10)
}
  0x1d   :  { %s819_s14 = smov 128   ;;  %s820_s15 = smov 8  }
  0x1e   :  { %56 = dma.hbm_to_vmem [thread:$0]  %s1047_s8, 512, %s51_s24, [#allocation9], %s819_s14, %s819_s14, %s820_s15  }
  0x1f   :  { %s766_s20 = scalar_lea.hbm %s1044_s5, 1024 }
  0x20   :  { %p767_p11 = scmp.ne.s32.totalorder %s1044_s5, %s766_s20  ;;  %p770_p12 = scmp.lt.u32.totalorder %s766_s20, %s1044_s5 }
  0x22   :  { %p772_p13 = pnand %p770_p12, %p767_p11 }
  0x24   :  { %775 = shalt.err (!%p772_p13)
}
  0x25   :  { %s776_s27 = scalar_lea.vmem %s895_s26, 1024  ;;  %p781_p1 = scmp.lt.s32.totalorder %s895_s26, %s895_s26 }
  0x26   :  { %p777_p0 = scmp.ne.s32.totalorder %s895_s26, %s776_s27  ;;  %p782_p2 = scmp.lt.s32.totalorder %s776_s27, %s776_s27 }
  0x28   :  { %p783_p3 = por %p782_p2, %p781_p1 }
  0x2a   :  { %p784_p4 = pnand %p783_p3, %p777_p0 }
  0x2c   :  { %787 = shalt.err (!%p784_p4)
}
  0x2d   :  { %40 = dma.hbm_to_vmem [thread:$0]  %s1044_s5, 1024, %s895_s26, [#allocation7], %s819_s14, %s819_s14, %s820_s15  }
  0x2e   :  { %s821_s28 = smov [#allocation10]   ;;  %s788_s0 = scalar_lea.hbm %s1048_s9, 640 }
  0x2f   :  { %s62_s29 = sshll.u32 %s821_s28, 4  ;;  %p789_p5 = scmp.ne.s32.totalorder %s1048_s9, %s788_s0  ;;  %s63_s29 = int_to_ptr.vmem [resolvable:$true] %s62_s29 }
  0x30   :  { %p792_p6 = scmp.lt.u32.totalorder %s788_s0, %s1048_s9 }
  0x32   :  { %p794_p7 = pnand %p792_p6, %p789_p5 }
  0x34   :  { %797 = shalt.err (!%p794_p7)
}
  0x35   :  { %s798_s18 = scalar_lea.vmem %s63_s29, 640  ;;  %p803_p9 = scmp.lt.s32.totalorder %s63_s29, %s63_s29 }
  0x36   :  { %p799_p8 = scmp.ne.s32.totalorder %s63_s29, %s798_s18  ;;  %p804_p10 = scmp.lt.s32.totalorder %s798_s18, %s798_s18 }
  0x38   :  { %p805_p11 = por %p804_p10, %p803_p9 }
  0x3a   :  { %p806_p12 = pnand %p805_p11, %p799_p8 }
  0x3c   :  { %809 = shalt.err (!%p806_p12)
}
  0x3d   :  { %68 = dma.hbm_to_vmem [thread:$0]  %s1048_s9, 640, %s63_s29, [#allocation9], %s819_s14, %s819_s14, %s820_s15  }
  0x3e   :  { %812 = dma.done.wait [#allocation7], 1024  }
  0x3f   :  { %813 = vsyncadd [#allocation7], 4294966272 }
  0x40   :  { %814 = dma.done.wait [#allocation9], 1152  }
  0x41   :  { %815 = vsyncadd [#allocation9], 4294966144  ;;  %v822_v0 = vmov 0.0|0.0   ;;  %vm823_vm0 = vmmov 0   ;;  %v824_v1 = vmov 0.0   ;;  %v119_v2 = vld [vmem:[%s1045_s6] sm:$0xff]  ;;  %v87_v18 = vlaneseq }
  0x42   :  { %675 = vmatprep.subr.bf16.mxu0 %v822_v0  ;;  %618 = vmatprep.mubr.msk.f32.mxu0 %vm823_vm0, %v824_v1  ;;  %v120_v3 = vld [vmem:[%s1045_s6 + $0x8] sm:$0xff]  ;;  %v121_v4 = vld [vmem:[%s1045_s6 + $0x10] sm:$0xff]  ;;  %v122_v6 = vld [vmem:[%s1045_s6 + $0x18] sm:$0xff]  ;;  %s971_s28 = sld [smem:[#allocation5]]  ;;  %vm83_vm1 = vcmask 261120   ;;  %s977_s11 = sld [smem:[#allocation5 + $0x1]] }
  0x43   :  { %693 = vmatprep.subr.bf16.mxu1 %v822_v0  ;;  %648 = vmatprep.mubr.msk.f32.mxu1 %vm823_vm0, %v824_v1  ;;  %v676_v5 = vpack.c.bf16 %v120_v3, %v119_v2  ;;  %v679_v7 = vpack.c.bf16 %v122_v6, %v121_v4  ;;  %v276_v8 = vld [vmem:[%s1046_s7] sm:$0xff]  ;;  %v277_v9 = vld [vmem:[%s1046_s7 + $0x8] sm:$0xff]  ;;  %v278_v11 = vld [vmem:[%s1046_s7 + $0x10] sm:$0xff]  ;;  %vm128_vm2 = vcmask 1040384   ;;  %vm124_vm3 = vcmask 269312  }
  0x44   :  { %v694_v10 = vpack.c.bf16 %v277_v9, %v276_v8  ;;  %v111_v12 = vld [vmem:[#allocation6] sm:$0xff]  ;;  %v279_v13 = vld [vmem:[%s1046_s7 + $0x18] sm:$0xff]  ;;  %v82_v16 = vld [vmem:[%s1042_s3] sm:$0xff]  ;;  %v88_v24 = vshrl.u32 %v87_v18, 7  ;;  %v90_v25 = vand.u32 127, %v87_v18  ;;  %vm202_vm10 = vcmask 523264  }
  0x45   :  { %677 = vmatpush3.bf16.msra.mxu0 %v676_v5  ;;  %v112_v14 = vld [vmem:[#allocation6 + $0x8] sm:$0xff]  ;;  %v697_v15 = vpack.c.bf16 %v279_v13, %v278_v11  ;;  %v85_v17 = vld [vmem:[%s1043_s4] sm:$0xff]  ;;  %84 = vst.msk [vmem:[#allocation2] sm:$0xff] %vm83_vm1, %v82_v16  ;;  %v114_v23 = vld [vmem:[#allocation6 + $0x18] sm:$0xff]  ;;  %s826_s4 = smov 32   ;;  %vm552_vm11 = vcmask 785408  }
  0x46   :  { %678 = vmatprep.subr.bf16.mxu0 %v822_v0  ;;  %695 = vmatpush3.bf16.msra.mxu1 %v694_v10  ;;  %86 = vst.msk [vmem:[#allocation3] sm:$0xff] %vm83_vm1, %v85_v17  ;;  %v123_v19 = vld [vmem:[%s1045_s6 + $0x20] sm:$0x1]  ;;  %v682_v21 = vpack.c.bf16 %v112_v14, %v111_v12  ;;  %v115_v29 = vld [vmem:[#allocation6 + $0x20] sm:$0xff]  ;;  %v116_v30 = vld [vmem:[#allocation6 + $0x28] sm:$0xff]  ;;  %vm93_vm4 = vcmp.eq.s32.totalorder %v88_v24, 0 }
  0x47   :  { %696 = vmatprep.subr.bf16.mxu1 %v822_v0  ;;  %v107_v20 = vld [vmem:[%s1040_s1] sm:$0xff]  ;;  %vm101_vm6 = vcmp.eq.s32.totalorder %v88_v24, 1  ;;  %v688_v32 = vpack.c.bf16 %v116_v30, %v115_v29  ;;  %v118_v34 = vld [vmem:[#allocation6 + $0x38] sm:$0xff]  ;;  %s825_s1 = smov 64   ;;  %v388_v57 = vld [vmem:[#allocation10] sm:$0xff] }
  0x48   :  { %v113_v22 = vld [vmem:[#allocation6 + $0x10] sm:$0xff]  ;;  %v94_v26 = vstv %s971_s28  ;;  %v102_v27 = vstv %s977_s11  ;;  %v389_v58 = vld [vmem:[#allocation10 + $0x8] sm:$0xff]  ;;  %v391_v61 = vld [vmem:[#allocation10 + $0x18] sm:$0xff] }
  0x49   :  { %680 = vmatpush3.bf16.msra.mxu0 %v679_v7  ;;  %v685_v28 = vpack.c.bf16 %v114_v23, %v113_v22  ;;  %vm95_vm5 = vcmp.eq.s32.totalorder %v90_v25, %v94_v26  ;;  %vm103_vm7 = vcmp.eq.s32.totalorder %v90_v25, %v102_v27  ;;  %v117_v33 = vld [vmem:[#allocation6 + $0x30] sm:$0xff]  ;;  %v700_v60 = vpack.c.bf16 %v389_v58, %v388_v57  ;;  %v384_v2 = vld [vmem:[#allocation8] sm:$0xff]  ;;  %v385_v3 = vld [vmem:[#allocation8 + $0x8] sm:$0xff] }
  0x4a   :  { %616 = vmatprep.subr.mxu0 %v824_v1  ;;  %698 = vmatpush3.bf16.msra.mxu1 %v697_v15  ;;  %vm96_vm8 = vmand %vm93_vm4, %vm95_vm5  ;;  %v691_v35 = vpack.c.bf16 %v118_v34, %v117_v33  ;;  %v390_v59 = vld [vmem:[#allocation10 + $0x10] sm:$0xff]  ;;  %v392_v4 = vld [vmem:[#allocation10 + $0x20] sm:$0x1]  ;;  %v706_v6 = vpack.c.bf16 %v385_v3, %v384_v2 }
  0x4b   :  { %699 = vmatprep.subr.bf16.mxu1 %v822_v0  ;;  %vm104_vm9 = vmand %vm101_vm6, %vm103_vm7  ;;  %v97_v36 = vsel %vm96_vm8, 1.0, %v824_v1  ;;  %v703_v62 = vpack.c.bf16 %v391_v61, %v390_v59  ;;  %v108_v5 = vld [vmem:[%s1041_s2] sm:$0xff]  ;;  %v387_v8 = vld [vmem:[#allocation8 + $0x18] sm:$0xff]  ;;  %s827_s2 = smov 96  }
  0x4c   :  { %v109_v31 = vld [vmem:[#allocation2] sm:$0xff]  ;;  %v105_v37 = vsel %vm104_vm9, 1.0, %v824_v1 }
  0x4d   :  { %617 = vmatpush3.msk.msra.mxu0 %vm128_vm2, %v123_v19  ;;  %649 = vmatmul.mubr.msk.f32.vlgmr.msra.gmra.mrb[0].mxu1 %vm83_vm1, %v109_v31  ;;  %v106_v38 = vadd.f32 %v105_v37, %v97_v36  ;;  %v110_v50 = vld [vmem:[#allocation3] sm:$0xff]  ;;  %v386_v7 = vld [vmem:[#allocation8 + $0x10] sm:$0xff] }
  0x4e   :  { %681 = vmatprep.subr.bf16.mxu0 %v822_v0  ;;  %619 = vmatmul.mubr.msk.f32.vlgmr.msra.gmra.mrb[0].mxu0 %vm124_vm3, %v107_v20  ;;  %v709_v9 = vpack.c.bf16 %v387_v8, %v386_v7 }
  0x4f   :  { %683 = vmatpush3.bf16.msra.mxu0 %v682_v21  ;;  %637 = vmatprep.mubr.msk.f32.mxu0 %vm823_vm0, %v824_v1 }
  0x50   :  { %684 = vmatprep.subr.bf16.mxu0 %v822_v0  ;;  %661 = vmatprep.mubr.msk.f32.mxu1 %vm823_vm0, %v824_v1 }
  0x51   :  { %701 = vmatpush3.bf16.msra.mxu1 %v700_v60 }
  0x52   :  { %702 = vmatprep.subr.bf16.mxu1 %v822_v0 }
  0x53   :  { %686 = vmatpush3.bf16.msra.mxu0 %v685_v28 }
  0x54   :  { %687 = vmatprep.subr.bf16.mxu0 %v822_v0 }
  0x55   :  { %704 = vmatpush3.bf16.msra.mxu1 %v703_v62 }
  0x56   :  { %659 = vmatprep.subr.mxu1 %v824_v1 }
  0x57   :  { %689 = vmatpush3.bf16.msra.mxu0 %v688_v32 }
  0x58   :  { %690 = vmatprep.subr.bf16.mxu0 %v822_v0 }
  0x59   :  { %660 = vmatpush3.msk.msra.mxu1 %vm128_vm2, %v392_v4 }
  0x5a   :  { %705 = vmatprep.subr.bf16.mxu1 %v822_v0  ;;  %662 = vmatmul.mubr.msk.f32.vlgmr.msra.gmra.mrb[2].mxu1 %vm124_vm3, %v108_v5 }
  0x5b   :  { %692 = vmatpush3.bf16.msra.mxu0 %v691_v35  ;;  %707 = vmatpush3.bf16.msra.mxu1 %v706_v6 }
  0x5c   :  { %672 = vmatprep.mubr.msk.f32.mxu1 %vm823_vm0, %v824_v1  ;;  %708 = vmatprep.subr.bf16.mxu1 %v822_v0 }
  0x5e   :  { %638 = vmatmul.mubr.msk.f32.vlgmr.msra.gmra.mrb[0].mxu0 %vm202_vm10, %v106_v38 }
  0x5f   :  { %710 = vmatpush3.bf16.msra.mxu1 %v709_v9 }
 0x120   :  { %v350_v39 = vpop.f32.mrb[0].mxu1 }
 0x121   :  { %v650_v40 = vpop.f32.mrb[1].mxu1 }
 0x131   :  { %v272_v41 = vpop.f32.mrb[0].mxu0 }
 0x132   :  { %v711_v42 = vadd.f32 %v350_v39, %v272_v41  ;;  %v639_v43 = vpop.f32.mrb[1].mxu0 }
 0x134   :  { %v572_v44 = vmul.f32 -1.442695, %v711_v42 }
 0x136   :  { %728 = vpow2.f32 %v572_v44 }
 0x140   :  { %v729_v45 = vpop.eup %728 }
 0x141   :  { %v358_v46 = vadd.f32 1.0, %v729_v45 }
 0x143   :  { %730 = vrcp.f32 %v358_v46 }
 0x14d   :  { %v731_v47 = vpop.eup %730 }
 0x14e   :  { %v361_v48 = vmul.f32 2.0, %v731_v47 }
 0x150   :  { %v573_v49 = vadd.f32 -1.0, %v361_v48 }
 0x152   :  { %369 = vrot.lane.b32.xlu0 %v573_v49, %s825_s1 }
 0x156   :  { %364 = vrot.lane.b32.xlu0 %v110_v50, %s826_s4 }
 0x1c4   :  { %v370_v51 = vpop.permute.xlu0 %369 }
 0x1c5   :  { %v372_v52 = vmul.f32 %v731_v47, %v370_v51 }
 0x1c7   :  { %374 = vrot.lane.b32.xlu1 %v372_v52, %s826_s4 }
 0x1c8   :  { %v365_v53 = vpop.permute.xlu0 %364 }
 0x1c9   :  { %v367_v54 = vmul.f32 %v731_v47, %v365_v53 }
 0x239   :  { %v375_v55 = vpop.permute.xlu1 %374 }
 0x23a   :  { %v377_v56 = vadd.f32 %v375_v55, %v367_v54 }
 0x23c   :  { %732 = vtanh.f32 %v377_v56 }
 0x246   :  { %v733_v63 = vpop.eup %732 }
 0x247   :  { %380 = vrot.lane.b32.xlu1 %v733_v63, %s825_s1 }
 0x2b9   :  { %v381_v10 = vpop.permute.xlu1 %380 }
 0x2ba   :  { %v383_v11 = vmul.f32 %v731_v47, %v381_v10 }
 0x2bc   :  { %544 = vrot.lane.b32.xlu1 %v383_v11, %s827_s2  ;;  %470 = vrot.lane.b32.xlu0 %v383_v11, %s826_s4 }
 0x2c0   :  { %557 = vrot.lane.b32.xlu1 %v377_v56, %s827_s2  ;;  %548 = vrot.lane.b32.xlu0 %v377_v56, %s825_s1 }
 0x32e   :  { %v545_v12 = vpop.permute.xlu1 %544  ;;  %v471_v13 = vpop.permute.xlu0 %470 }
 0x32f   :  { %556 = vst.msk [vmem:[#allocation2] sm:$0xff] %vm83_vm1, %v471_v13  ;;  %673 = vmatmul.mubr.msk.f32.vlgmr.msra.gmra.mrb[2].mxu1 %vm83_vm1, %v471_v13 }
 0x332   :  { %v558_v14 = vpop.permute.xlu1 %557  ;;  %v549_v1 = vpop.permute.xlu0 %548 }
 0x333   :  { %560 = vst.msk [vmem:[#allocation3] sm:$0xff] %vm83_vm1, %v558_v14 }
 0x402   :  { %v540_v0 = vpop.f32.mrb[2].mxu1 }
 0x403   :  { %v551_v15 = vsel %vm202_vm10, %v540_v0, %v545_v12  ;;  %v674_v16 = vpop.f32.mrb[3].mxu1 }
 0x404   :  { %v553_v17 = vsel %vm552_vm11, %v551_v15, %v549_v1 }
 0x405   :  { %554 = vst [vmem:[%s1049_s10] sm:$0xff] %v553_v17 }
 0x406   :  { %565 = vsyncpa [#allocation7], 1 }
 0x407   :  { %566 = vsyncpa [#allocation9], 1 }

</bundles_post_ra>
